<compile_context>
chip_gen: v7x
topology: tpu7x:2x2x1
jax: 0.10.0
libtpu: 0.0.40
codegen_flags: <defaults>
</compile_context>

<pallas_src>
import jax
import jax.numpy as jnp
from jax.experimental import pallas as pl
from jax.experimental.pallas import tpu as pltpu

NPAD = 8          # sublane-padded number of output heads (1 conf + num_cls <= 8)
B_TILE_MAX = 32   # cap on batch elements folded into one grid step


def _cdiv(a, b):
    return -(-a // b)


def _head_kernel(x_ref, w_ref, b_ref, o_ref):
    # x_ref: (b_tile, C, THW)   w_ref: (NPAD, C)   b_ref: (NPAD, 1) f32
    # o_ref: (b_tile, NPAD, THW)
    w = w_ref[...]
    b = b_ref[...]
    for i in range(x_ref.shape[0]):  # static, small unrolled loop over batch tile
        acc = jnp.dot(w, x_ref[i], preferred_element_type=jnp.float32)
        o_ref[i] = (acc + b).astype(o_ref.dtype)


def lightweight_conv2d_head_forward(x_nchw, w_conf, b_conf, w_cls, b_cls,
                                    *, block_vmem_bytes=16 * 1024 * 1024):
    """Forward pass of LightweightConv2dHead.

    x_nchw : (B, C_in, H, W)  f32 or bf16
    w_conf : (1, C_in)        b_conf : (1,)        -- Conv2d(C_in, 1, k=1), k dims squeezed
    w_cls  : (num_cls, C_in)  b_cls  : (num_cls,)  -- Conv2d(C_in, num_cls, k=1)
    Returns {'conf': (B, 1, H, W), 'cls': (B, num_cls, H, W)} in x's dtype.
    """
    B, C, H, W = x_nchw.shape
    num_cls = w_cls.shape[0]
    n_out = 1 + num_cls
    assert n_out <= NPAD, "fused head count must fit in one sublane group"

    HW = H * W

    # Matmul/compute dtype: keep native f32/bf16 (no wrapper cast pass); anything
    # else falls back to an f32 cast (rare path).
    if x_nchw.dtype == jnp.float32 or x_nchw.dtype == jnp.bfloat16:
        mm_dtype = x_nchw.dtype
    else:
        mm_dtype = jnp.float32
        x_nchw = x_nchw.astype(jnp.float32)
    out_dtype = x_nchw.dtype

    x_itemsize = jnp.dtype(mm_dtype).itemsize
    out_itemsize = jnp.dtype(out_dtype).itemsize

    # ---- tile sizing from the VMEM budget (double-buffered in+out blocks) ----
    per_lane_bytes = C * x_itemsize + NPAD * out_itemsize
    budget_per_buffer = max(block_vmem_bytes // 2, per_lane_bytes * 128)
    t_hw_cap = max(128, (budget_per_buffer // per_lane_bytes) // 128 * 128)

    if HW <= t_hw_cap:
        t_hw = HW                 # full extent (exempt from the 128-multiple rule)
        grid_hw = 1
    else:
        t_hw = t_hw_cap           # multiple of 128; last block ragged (cdiv grid)
        grid_hw = _cdiv(HW, t_hw)

    # Fold batches per grid step when the whole feature map fits in one tile.
    b_tile = 1
    if grid_hw == 1:
        per_batch_bytes = per_lane_bytes * HW
        b_tile = max(1, min(B, B_TILE_MAX, budget_per_buffer // per_batch_bytes))
    grid_b = _cdiv(B, b_tile)
    grid = (grid_b, grid_hw)

    # NCHW -> (B, C, HW): pure reshape of contiguous memory, no transpose pass.
    x_flat = x_nchw.reshape(B, C, HW)

    # Fused weight (NPAD, C): row 0 = conf head, rows 1..num_cls = cls head.
    w_fused = jnp.zeros((NPAD, C), mm_dtype)
    w_fused = w_fused.at[0:1, :].set(w_conf.astype(mm_dtype))
    w_fused = w_fused.at[1:n_out, :].set(w_cls.astype(mm_dtype))
    # Fused bias (NPAD, 1): per-sublane scalar, kept in f32 for the accumulate.
    b_fused = jnp.zeros((NPAD, 1), jnp.float32)
    b_fused = b_fused.at[0:1, 0].set(b_conf.astype(jnp.float32))
    b_fused = b_fused.at[1:n_out, 0].set(b_cls.astype(jnp.float32))

    cost = pl.CostEstimate(
        flops=2 * B * HW * C * NPAD,
        transcendentals=0,
        bytes_accessed=(x_itemsize * B * C * HW
                        + out_itemsize * B * NPAD * HW
                        + x_itemsize * NPAD * C + 4 * NPAD),
    )

    y = pl.pallas_call(
        _head_kernel,
        out_shape=jax.ShapeDtypeStruct((B, NPAD, HW), out_dtype),
        grid_spec=pltpu.PrefetchScalarGridSpec(
            num_scalar_prefetch=0,
            grid=grid,
            in_specs=[
                pl.BlockSpec((b_tile, C, t_hw), lambda bi, j: (bi, 0, j)),
                pl.BlockSpec((NPAD, C), lambda bi, j: (0, 0)),   # grid-invariant
                pl.BlockSpec((NPAD, 1), lambda bi, j: (0, 0)),   # grid-invariant
            ],
            out_specs=pl.BlockSpec((b_tile, NPAD, t_hw), lambda bi, j: (bi, 0, j)),
        ),
        compiler_params=pltpu.CompilerParams(
            dimension_semantics=("parallel", "parallel"),
            vmem_limit_bytes=32 * 1024 * 1024,
        ),
        cost_estimate=cost,
    )(x_flat, w_fused, b_fused)

    # (B, NPAD, HW) -> static slices + contiguous reshapes, no transposes.
    conf = y[:, 0:1, :].reshape(B, 1, H, W)
    cls = y[:, 1:n_out, :].reshape(B, num_cls, H, W)
    return {'conf': conf, 'cls': cls}


def _reference_forward(x_nchw, w_conf, b_conf, w_cls, b_cls):
    # Pure-JAX reference: a 1x1 conv is an einsum over the channel dim.
    conf = jnp.einsum('bchw,oc->bohw', x_nchw, w_conf) + b_conf[None, :, None, None]
    cls = jnp.einsum('bchw,oc->bohw', x_nchw, w_cls) + b_cls[None, :, None, None]
    return {'conf': conf, 'cls': cls}


if __name__ == "__main__":
    # Shapes consistent with the module defaults: in_channels=32, num_cls=6.
    B, C_in, H, W = 2, 32, 16, 16
    num_cls = 6

    key = jax.random.PRNGKey(0)
    kx, kwc, kbc, kwk, kbk = jax.random.split(key, 5)

    x = jax.random.normal(kx, (B, C_in, H, W), dtype=jnp.float32)
    # Deterministic synthetic Conv2d 1x1 parameters (kernel dims squeezed).
    w_conf = jax.random.normal(kwc, (1, C_in), dtype=jnp.float32) * 0.1
    b_conf = jax.random.normal(kbc, (1,), dtype=jnp.float32) * 0.1
    w_cls = jax.random.normal(kwk, (num_cls, C_in), dtype=jnp.float32) * 0.1
    b_cls = jax.random.normal(kbk, (num_cls,), dtype=jnp.float32) * 0.1

    out = lightweight_conv2d_head_forward(x, w_conf, b_conf, w_cls, b_cls)
    jax.block_until_ready(out)

    ref = _reference_forward(x, w_conf, b_conf, w_cls, b_cls)
    assert out['conf'].shape == (B, 1, H, W)
    assert out['cls'].shape == (B, num_cls, H, W)
    assert jnp.allclose(out['conf'], ref['conf'], atol=1e-4, rtol=1e-4)
    assert jnp.allclose(out['cls'], ref['cls'], atol=1e-4, rtol=1e-4)

    # Exercise the cdiv / ragged-tile path: HW = 24*24 = 576 is not a multiple
    # of the 128-lane tile forced by a tiny block-VMEM budget (last block OOB).
    H2 = W2 = 24
    x2 = jax.random.normal(kx, (1, C_in, H2, W2), dtype=jnp.float32)
    out2 = lightweight_conv2d_head_forward(x2, w_conf, b_conf, w_cls, b_cls,
                                           block_vmem_bytes=64 * 1024)
    jax.block_until_ready(out2)
    ref2 = _reference_forward(x2, w_conf, b_conf, w_cls, b_cls)
    assert jnp.allclose(out2['conf'], ref2['conf'], atol=1e-4, rtol=1e-4)
    assert jnp.allclose(out2['cls'], ref2['cls'], atol=1e-4, rtol=1e-4)

    print("KERNEL_OK")
</pallas_src>

<mosaic_0001>
module attributes {stable_mosaic.version = 11 : i64} {
  func.func @_head_kernel(%arg0: i32, %arg1: i32, %arg2: memref<2x32x256xf32, #tpu.memory_space<vmem>>, %arg3: memref<8x32xf32, #tpu.memory_space<vmem>>, %arg4: memref<8x1xf32, #tpu.memory_space<vmem>>, %arg5: memref<2x8x256xf32, #tpu.memory_space<vmem>>) attributes {dimension_semantics = [#tpu.dimension_semantics<parallel>, #tpu.dimension_semantics<parallel>], iteration_bounds = array<i64: 1, 1>, scalar_prefetch = 0 : i64, scratch_operands = 0 : i64, tpu.core_type = #tpu.core_type<tc>, window_params = [{transform_indices = @transform_0, window_bounds = array<i64: 2, 32, 256>}, {pipeline_mode = #tpu.pipeline_mode<synchronous>, transform_indices = @transform_1, window_bounds = array<i64: 8, 32>}, {pipeline_mode = #tpu.pipeline_mode<synchronous>, transform_indices = @transform_2, window_bounds = array<i64: 8, 1>}, {transform_indices = @transform_3, window_bounds = array<i64: 2, 8, 256>}]} {
    %c0 = arith.constant 0 : index
    %c0_0 = arith.constant 0 : index
    %0 = vector.load %arg3[%c0, %c0_0] : memref<8x32xf32, #tpu.memory_space<vmem>>, vector<8x32xf32>
    %c0_1 = arith.constant 0 : index
    %c0_2 = arith.constant 0 : index
    %1 = vector.load %arg4[%c0_1, %c0_2] : memref<8x1xf32, #tpu.memory_space<vmem>>, vector<8x1xf32>
    %c0_3 = arith.constant 0 : index
    %c0_4 = arith.constant 0 : index
    %c0_5 = arith.constant 0 : index
    %2 = vector.load %arg2[%c0_3, %c0_4, %c0_5] : memref<2x32x256xf32, #tpu.memory_space<vmem>>, vector<1x32x256xf32>
    %3 = vector.shape_cast %2 : vector<1x32x256xf32> to vector<32x256xf32>
    %cst = arith.constant dense<0.000000e+00> : vector<8x256xf32>
    %4 = tpu.matmul %0, %3, %cst {dimension_numbers = #tpu.dot_dimension_numbers<[1], [0], [0], [1], [0, 0, 1, 1], [], []>} : vector<8x32xf32>, vector<32x256xf32>, vector<8x256xf32> -> vector<8x256xf32>
    %5 = vector.broadcast %1 : vector<8x1xf32> to vector<8x256xf32>
    %6 = arith.addf %4, %5 : vector<8x256xf32>
    %c0_6 = arith.constant 0 : index
    %c0_7 = arith.constant 0 : index
    %c0_8 = arith.constant 0 : index
    %7 = vector.load %arg5[%c0_6, %c0_7, %c0_8] : memref<2x8x256xf32, #tpu.memory_space<vmem>>, vector<1x8x256xf32>
    %8 = vector.shape_cast %7 : vector<1x8x256xf32> to vector<8x256xf32>
    %9 = vector.shape_cast %6 : vector<8x256xf32> to vector<1x8x256xf32>
    tpu.vector_store %arg5[%c0_6, %c0_7, %c0_8], %9 {strides = array<i32>} : memref<2x8x256xf32, #tpu.memory_space<vmem>>, vector<1x8x256xf32>,
    %c1 = arith.constant 1 : index
    %c0_9 = arith.constant 0 : index
    %c0_10 = arith.constant 0 : index
    %10 = vector.load %arg2[%c1, %c0_9, %c0_10] : memref<2x32x256xf32, #tpu.memory_space<vmem>>, vector<1x32x256xf32>
    %11 = vector.shape_cast %10 : vector<1x32x256xf32> to vector<32x256xf32>
    %cst_11 = arith.constant dense<0.000000e+00> : vector<8x256xf32>
    %12 = tpu.matmul %0, %11, %cst_11 {dimension_numbers = #tpu.dot_dimension_numbers<[1], [0], [0], [1], [0, 0, 1, 1], [], []>} : vector<8x32xf32>, vector<32x256xf32>, vector<8x256xf32> -> vector<8x256xf32>
    %13 = vector.broadcast %1 : vector<8x1xf32> to vector<8x256xf32>
    %14 = arith.addf %12, %13 : vector<8x256xf32>
    %c1_12 = arith.constant 1 : index
    %c0_13 = arith.constant 0 : index
    %c0_14 = arith.constant 0 : index
    %15 = vector.load %arg5[%c1_12, %c0_13, %c0_14] : memref<2x8x256xf32, #tpu.memory_space<vmem>>, vector<1x8x256xf32>
    %16 = vector.shape_cast %15 : vector<1x8x256xf32> to vector<8x256xf32>
    %17 = vector.shape_cast %14 : vector<8x256xf32> to vector<1x8x256xf32>
    tpu.vector_store %arg5[%c1_12, %c0_13, %c0_14], %17 {strides = array<i32>} : memref<2x8x256xf32, #tpu.memory_space<vmem>>, vector<1x8x256xf32>,
    return
  }
  func.func @transform_0(%arg0: i32, %arg1: i32) -> (i32, i32, i32) {
    %c0_i32 = arith.constant 0 : i32
    %c0_i32_0 = arith.constant 0 : i32
    return %arg0, %c0_i32, %arg1 : i32, i32, i32
  }
  func.func @transform_1(%arg0: i32, %arg1: i32) -> (i32, i32) {
    %c0_i32 = arith.constant 0 : i32
    %c0_i32_0 = arith.constant 0 : i32
    %c0_i32_1 = arith.constant 0 : i32
    return %c0_i32, %c0_i32_0 : i32, i32
  }
  func.func @transform_2(%arg0: i32, %arg1: i32) -> (i32, i32) {
    %c0_i32 = arith.constant 0 : i32
    %c0_i32_0 = arith.constant 0 : i32
    %c0_i32_1 = arith.constant 0 : i32
    return %c0_i32, %c0_i32_0 : i32, i32
  }
  func.func @transform_3(%arg0: i32, %arg1: i32) -> (i32, i32, i32) {
    %c0_i32 = arith.constant 0 : i32
    %c0_i32_0 = arith.constant 0 : i32
    return %arg0, %c0_i32, %arg1 : i32, i32, i32
  }
}

</mosaic_0001>

<bundles_post_ra>
// kernel: tpu_custom_call.1
= control target key start
LH: loop header
LB: loop body
LE: loop exit
PB: predicated region body
PF: predicated region fallthrough
CT: control target
= control target key end

     0   :  { %8 = vsyncpa [#allocation3], 0  ;;  %s356_s0 = inlined_call_operand.hbm [shape: f32[2,32,256], index: 0, kind: input, shape index: {}]   ;;  %s357_s1 = inlined_call_operand.vmem [shape: f32[8,32], index: 1, kind: input, shape index: {}]   ;;  %s358_s2 = inlined_call_operand.vmem [shape: f32[8,1], index: 2, kind: input, shape index: {}]   ;;  %s359_s3 = inlined_call_operand.hbm [shape: f32[2,8,256], index: 3, kind: output, shape index: {}]  }
   0x1   :  { %9 = vsyncpa [#allocation4], 0  ;;  %s294_s12 = smov [#allocation2]   ;;  %s246_s16 = scalar_lea.hbm %s356_s0, 2048 }
   0x2   :  { %s15_s13 = sshll.u32 %s294_s12, 4  ;;  %p247_p0 = scmp.ne.s32.totalorder %s356_s0, %s246_s16  ;;  %s16_s13 = int_to_ptr.vmem [resolvable:$true] %s15_s13 }
   0x3   :  { %p250_p1 = scmp.lt.u32.totalorder %s246_s16, %s356_s0 }
   0x5   :  { %p252_p2 = pnand %p250_p1, %p247_p0 }
   0x7   :  { %255 = shalt.err (!%p252_p2)
}
   0x8   :  { %s256_s21 = scalar_lea.vmem %s16_s13, 2048  ;;  %p261_p4 = scmp.lt.s32.totalorder %s16_s13, %s16_s13 }
   0x9   :  { %p257_p3 = scmp.ne.s32.totalorder %s16_s13, %s256_s21  ;;  %p262_p5 = scmp.lt.s32.totalorder %s256_s21, %s256_s21 }
   0xb   :  { %p263_p6 = por %p262_p5, %p261_p4 }
   0xd   :  { %p264_p7 = pnand %p263_p6, %p257_p3 }
   0xf   :  { %267 = shalt.err (!%p264_p7)
}
  0x10   :  { %s295_s22 = smov 256   ;;  %s296_s23 = smov 16  }
  0x11   :  { %21 = dma.hbm_to_vmem [thread:$0]  %s356_s0, 2048, %s16_s13, [#allocation3], %s295_s22, %s295_s22, %s296_s23  }
  0x12   :  { %290 = dma.done.wait [#allocation3], 2048  }
  0x13   :  { %291 = vsyncadd [#allocation3], 4294965248  ;;  %v297_v0 = vmov 0.0   ;;  %v298_v1 = vmov 0   ;;  %v32_v2 = vld [vmem:[#allocation2 + $0x8] sm:$0xff]  ;;  %v34_v3 = vld [vmem:[#allocation2 + $0x18] sm:$0xff] }
  0x14   :  { %112 = vmatprep.mubr.f32.mxu0 %v297_v0  ;;  %194 = vmatprep.mubr.f32.mxu1 %v297_v0  ;;  %v123_v4 = vld [vmem:[#allocation2 + $0x48] sm:$0xff]  ;;  %v223_v5 = vpack.c.bf16 %v34_v3, %v32_v2  ;;  %v125_v6 = vld [vmem:[#allocation2 + $0x58] sm:$0xff]  ;;  %v31_v7 = vld [vmem:[#allocation2] sm:$0xff]  ;;  %vm44_vm0 = vcmask 261120   ;;  %s299_s29 = smov [#allocation5]  }
  0x15   :  { %245 = vset.pattern.permute.xlu0 %v298_v1  ;;  %v33_v8 = vld [vmem:[#allocation2 + $0x10] sm:$0xff]  ;;  %v231_v9 = vpack.c.bf16 %v125_v6, %v123_v4  ;;  %v122_v11 = vld [vmem:[#allocation2 + $0x40] sm:$0xff]  ;;  %v36_v13 = vld [vmem:[#allocation2 + $0x28] sm:$0xff]  ;;  %s209_s30 = sshll.u32 %s299_s29, 4  ;;  %s210_s30 = int_to_ptr.vmem [resolvable:$true] %s209_s30 }
  0x16   :  { %v225_v10 = vpack.c.bf16 %v33_v8, %v31_v7  ;;  %v124_v12 = vld [vmem:[#allocation2 + $0x50] sm:$0xff]  ;;  %224 = vmatprep.subr.bf16.mxu0 %v223_v5  ;;  %v38_v15 = vld [vmem:[#allocation2 + $0x38] sm:$0xff]  ;;  %v127_v16 = vld [vmem:[#allocation2 + $0x68] sm:$0xff]  ;;  %p273_p9 = scmp.lt.s32.totalorder %s210_s30, %s210_s30 }
  0x17   :  { %v233_v14 = vpack.c.bf16 %v124_v12, %v122_v11  ;;  %v129_v17 = vld [vmem:[#allocation2 + $0x78] sm:$0xff]  ;;  %232 = vmatprep.subr.bf16.mxu1 %v231_v9  ;;  %v227_v18 = vpack.c.bf16 %v38_v15, %v36_v13  ;;  %v35_v20 = vld [vmem:[#allocation2 + $0x20] sm:$0xff]  ;;  %v37_v21 = vld [vmem:[#allocation2 + $0x30] sm:$0xff] }
  0x18   :  { %226 = vmatpush1.bf16.msra.mxu0 %v225_v10  ;;  %v235_v19 = vpack.c.bf16 %v129_v17, %v127_v16  ;;  %v126_v22 = vld [vmem:[#allocation2 + $0x60] sm:$0xff]  ;;  %v229_v23 = vpack.c.bf16 %v37_v21, %v35_v20  ;;  %v128_v24 = vld [vmem:[#allocation2 + $0x70] sm:$0xff] }
  0x19   :  { %234 = vmatpush1.bf16.msra.mxu1 %v233_v14  ;;  %v30_v25 = vld [vmem:[%s358_s2] sm:$0xff]  ;;  %228 = vmatprep.subr.bf16.mxu0 %v227_v18  ;;  %v237_v26 = vpack.c.bf16 %v128_v24, %v126_v22 }
  0x1a   :  { %236 = vmatprep.subr.bf16.mxu1 %v235_v19  ;;  %41 = vperm.xlu0 %245, %v30_v25   ;;  %v29_v27 = vld [vmem:[%s357_s1] sm:$0xff]  ;;  %s268_s1 = scalar_lea.vmem %s210_s30, 512 }
  0x1b   :  { %p269_p8 = scmp.ne.s32.totalorder %s210_s30, %s268_s1  ;;  %p274_p10 = scmp.lt.s32.totalorder %s268_s1, %s268_s1 }
  0x1c   :  { %230 = vmatpush1.bf16.msra.mxu0 %v229_v23 }
  0x1d   :  { %238 = vmatpush1.bf16.msra.mxu1 %v237_v26  ;;  %p275_p11 = por %p274_p10, %p273_p9 }
  0x1f   :  { %221 = vmatmul.mubr.msk.f32.vlgmr.msra.gmra.mrb[0].mxu0 %vm44_vm0, %v29_v27  ;;  %p276_p12 = pnand %p275_p11, %p269_p8 }
  0x20   :  { %222 = vmatmul.mubr.msk.f32.vlgmr.msra.gmra.mrb[0].mxu1 %vm44_vm0, %v29_v27 }
  0x99   :  { %v42_v28 = vpop.permute.xlu0 %41 }
  0xf2   :  { %v114_v29 = vpop.f32.mrb[0].mxu0 }
  0xf3   :  { %v115_v30 = vadd.f32 %v114_v29, %v42_v28  ;;  %v196_v31 = vpop.f32.mrb[0].mxu1  ;;  %v116_v32 = vpop.f32.mrb[1].mxu0 }
  0xf4   :  { %v197_v33 = vadd.f32 %v196_v31, %v42_v28  ;;  %v117_v34 = vadd.f32 %v116_v32, %v42_v28  ;;  %v198_v35 = vpop.f32.mrb[1].mxu1 }
  0xf5   :  { %119 = vst [vmem:[#allocation5] sm:$0xff] %v115_v30  ;;  %v199_v36 = vadd.f32 %v198_v35, %v42_v28 }
  0xf6   :  { %202 = vst [vmem:[#allocation5 + $0x10] sm:$0xff] %v197_v33  ;;  %120 = vst [vmem:[#allocation5 + $0x8] sm:$0xff] %v117_v34 }
  0xf7   :  { %203 = vst [vmem:[#allocation5 + $0x18] sm:$0xff] %v199_v36 }
  0xf8   :  { %279 = shalt.err (!%p276_p12)
}
  0xf9   :  { %s280_s5 = scalar_lea.hbm %s359_s3, 512 }
  0xfa   :  { %p281_p13 = scmp.ne.s32.totalorder %s359_s3, %s280_s5  ;;  %p284_p0 = scmp.lt.u32.totalorder %s280_s5, %s359_s3 }
  0xfc   :  { %p286_p1 = pnand %p284_p0, %p281_p13 }
  0xfe   :  { %289 = shalt.err (!%p286_p1)
}
  0xff   :  { %215 = dma.vmem_to_hbm [thread:$0]  %s210_s30, 512, %s359_s3, [#allocation4], %s295_s22, %s295_s22, %s296_s23  }
 0x100   :  { %292 = dma.done.wait [#allocation4], 512  }
 0x101   :  { %293 = vsyncadd [#allocation4], 4294966784 }
 0x102   :  { %219 = vsyncpa [#allocation3], 1 }
 0x103   :  { %220 = vsyncpa [#allocation4], 1 }

</bundles_post_ra>
